<compile_context>
chip_gen: v7x
topology: tpu7x:2x2x1
jax: 0.10.0
libtpu: 0.0.40
codegen_flags: <defaults>
</compile_context>

<pallas_src>
import jax
import jax.numpy as jnp
from jax.experimental import pallas as pl
from jax.experimental.pallas import tpu as pltpu


# ---------------------------------------------------------------------------
# Kernel body: one lane-dense MXU matmul per grid step, (dim, dim) @ (dim, tn).
# ---------------------------------------------------------------------------
def _matmul_kernel(w_ref, x_ref, o_ref):
    o_ref[...] = jnp.dot(
        w_ref[...], x_ref[...], preferred_element_type=jnp.float32
    ).astype(o_ref.dtype)


def _compose_weight(w_p, w_l, w_u, w_s, s_sign):
    """Grid-invariant LU composition (done once, in f32, in the wrapper)."""
    dim = w_p.shape[0]
    row = jnp.arange(dim)[:, None]
    col = jnp.arange(dim)[None, :]
    u_mask = (col > row).astype(jnp.float32)
    l_mask = (row > col).astype(jnp.float32)
    eye = jnp.eye(dim, dtype=jnp.float32)
    lower = w_l.astype(jnp.float32) * l_mask + eye
    upper = w_u.astype(jnp.float32) * u_mask + jnp.diag(
        s_sign.astype(jnp.float32) * jnp.exp(w_s.astype(jnp.float32)))
    return w_p.astype(jnp.float32) @ lower @ upper


def _round_up(v, m):
    return ((v + m - 1) // m) * m


def _pick_col_tile(dim, cols, itemsize, other_parallel_steps=1, *,
                   target_tile_bytes=2 << 20, vmem_budget_bytes=24 << 20):
    """Column tile: >= ~2 MiB of x per step, 128-aligned, v7x-VMEM-safe."""
    row_bytes = max(1, dim * itemsize)
    want = max(128, target_tile_bytes // row_bytes)
    tn = 128
    while tn < want:
        tn *= 2
    # 2x(x tile) + 2x(out tile) double buffers must fit the (v7x 32 MiB scoped)
    # VMEM budget with headroom; the resident (dim, dim) weight is negligible.
    vmem_cap = max(128, (vmem_budget_bytes // (4 * row_bytes)) // 128 * 128)
    tn = min(tn, vmem_cap)
    if tn >= cols:
        if other_parallel_steps <= 1 and cols >= 256:
            # Split into >= 2 column tiles so both v7x TensorCores get work.
            half = _round_up(-(-cols // 2), 128)
            return half if half < cols else cols
        return cols            # full extent: always a legal block shape
    return tn                  # multiple of 128; ragged tail block is masked


def _forward_wide(weight, x, col_tile):
    """width >= 128: 2-D (batch, column-tile) grid, no HBM transpose."""
    bs, dim, width = x.shape
    itemsize = x.dtype.itemsize
    tn = col_tile if col_tile is not None else _pick_col_tile(
        dim, width, itemsize, other_parallel_steps=bs)
    if tn >= width:
        tn = width
    grid = (bs, pl.cdiv(width, tn))
    cost = pl.CostEstimate(
        flops=2 * bs * width * dim * dim,
        transcendentals=0,
        bytes_accessed=(2 * bs * dim * width + dim * dim) * itemsize)
    return pl.pallas_call(
        _matmul_kernel,
        out_shape=jax.ShapeDtypeStruct((bs, dim, width), x.dtype),
        grid_spec=pltpu.PrefetchScalarGridSpec(
            num_scalar_prefetch=0,
            grid=grid,
            in_specs=[
                # Weight: constant block index -> fetched once, grid-resident.
                pl.BlockSpec((dim, dim), lambda b, j: (0, 0)),
                # x column tile, batch dim squeezed out of the kernel ref.
                pl.BlockSpec((pl.Squeezed(), dim, tn), lambda b, j: (b, 0, j)),
            ],
            out_specs=pl.BlockSpec((pl.Squeezed(), dim, tn),
                                   lambda b, j: (b, 0, j)),
        ),
        compiler_params=pltpu.CompilerParams(
            dimension_semantics=("parallel", "parallel")),
        cost_estimate=cost,
    )(weight, x)


def _forward_folded(weight, x, col_tile):
    """width < 128: fold batch into the lane axis (input dtype, no upcast)."""
    bs, dim, width = x.shape
    n = bs * width
    itemsize = x.dtype.itemsize
    x2 = jnp.transpose(x, (1, 0, 2)).reshape(dim, n)
    tn = col_tile if col_tile is not None else _pick_col_tile(dim, n, itemsize)
    if tn >= n:
        tn = n
    grid = (pl.cdiv(n, tn),)
    cost = pl.CostEstimate(
        flops=2 * n * dim * dim,
        transcendentals=0,
        bytes_accessed=(2 * dim * n + dim * dim) * itemsize)
    out2 = pl.pallas_call(
        _matmul_kernel,
        out_shape=jax.ShapeDtypeStruct((dim, n), x.dtype),
        grid_spec=pltpu.PrefetchScalarGridSpec(
            num_scalar_prefetch=0,
            grid=grid,
            in_specs=[
                pl.BlockSpec((dim, dim), lambda j: (0, 0)),
                pl.BlockSpec((dim, tn), lambda j: (0, j)),
            ],
            out_specs=pl.BlockSpec((dim, tn), lambda j: (0, j)),
        ),
        compiler_params=pltpu.CompilerParams(
            dimension_semantics=("parallel",)),
        cost_estimate=cost,
    )(weight, x2)
    return jnp.transpose(out2.reshape(dim, bs, width), (1, 0, 2))


def inv_rotation_lu_forward(x, w_p, w_l, w_u, w_s, s_sign, *,
                            col_tile=None, min_pallas_cols=1024):
    """x: (bs, dim, width). Returns (out, logdet) matching the PyTorch module.

    out    = (P @ (L*l_mask + I) @ (U*u_mask + diag(sign*exp(w_s)))) @ x  per batch
    logdet = width * sum(w_s)
    """
    bs, dim, width = x.shape

    # Hoisted, grid-invariant work: weight composition (f32, then cast to the
    # input dtype so the kernel streams x/out at input precision) and logdet.
    weight = _compose_weight(w_p, w_l, w_u, w_s, s_sign).astype(x.dtype)
    logdet = jnp.float32(width) * jnp.sum(w_s.astype(jnp.float32))

    n_cols = bs * width
    if n_cols < min_pallas_cols:
        # Tiny problems: pallas_call fixed overhead dominates; use XLA directly.
        out = jnp.einsum("ij,bjk->bik", weight, x).astype(x.dtype)
    elif width >= 128:
        out = _forward_wide(weight, x, col_tile)
    else:
        out = _forward_folded(weight, x, col_tile)
    return out, logdet


def init_inv_rotation_lu_params(key, dim):
    """Deterministic re-implementation of the PyTorch __init__ (QR -> LU -> params)."""
    w0 = jax.random.normal(key, (dim, dim), dtype=jnp.float32)
    q, _ = jnp.linalg.qr(w0)
    p, l, u = jax.scipy.linalg.lu(q.astype(jnp.float32))
    w_s_diag = jnp.diag(u)
    w_u = jnp.triu(u, 1)
    s_sign = jnp.sign(w_s_diag)
    w_s = jnp.log(jnp.abs(w_s_diag))   # logabs(w_s)
    return dict(w_p=p, w_l=l, w_u=w_u, w_s=w_s, s_sign=s_sign)


def reference_forward(x, params):
    dim = params["w_p"].shape[0]
    row = jnp.arange(dim)[:, None]
    col = jnp.arange(dim)[None, :]
    u_mask = (col > row).astype(jnp.float32)
    l_mask = (row > col).astype(jnp.float32)
    eye = jnp.eye(dim, dtype=jnp.float32)
    lower = params["w_l"] * l_mask + eye
    upper = params["w_u"] * u_mask + jnp.diag(params["s_sign"] * jnp.exp(params["w_s"]))
    weight = params["w_p"] @ lower @ upper
    out = jnp.einsum("ij,bjk->bik", weight, x)
    logdet = x.shape[2] * jnp.sum(params["w_s"])
    return out, logdet


if __name__ == "__main__":
    key = jax.random.PRNGKey(0)
    k_param, k1, k2, k3 = jax.random.split(key, 4)

    dim = 16
    params = init_inv_rotation_lu_params(k_param, dim)
    p_args = (params["w_p"], params["w_l"], params["w_u"],
              params["w_s"], params["s_sign"])

    # 1) width >= 128 path: 2-D (batch, column-tile) grid, no HBM transpose.
    #    col_tile=128 forces 3 column tiles with a ragged last block (320 = 2*128+64)
    #    to exercise Pallas masking of the tail tile.
    x1 = jax.random.normal(k1, (4, dim, 320), dtype=jnp.float32)
    out1, ld1 = inv_rotation_lu_forward(x1, *p_args, col_tile=128)
    out1 = jax.block_until_ready(out1)
    ld1 = jax.block_until_ready(ld1)
    ref1, rld1 = reference_forward(x1, params)
    assert jnp.allclose(out1, ref1, atol=1e-4, rtol=1e-4), "wide path: output mismatch"
    assert jnp.allclose(ld1, rld1, atol=1e-4, rtol=1e-4), "wide path: logdet mismatch"

    # 2) width < 128 path: batch folded into the lane axis (input dtype, no upcast).
    x2 = jax.random.normal(k2, (64, dim, 32), dtype=jnp.float32)
    out2, ld2 = inv_rotation_lu_forward(x2, *p_args)
    out2 = jax.block_until_ready(out2)
    ref2, rld2 = reference_forward(x2, params)
    assert jnp.allclose(out2, ref2, atol=1e-4, rtol=1e-4), "folded path: output mismatch"
    assert jnp.allclose(ld2, rld2, atol=1e-4, rtol=1e-4), "folded path: logdet mismatch"

    # 3) tiny-problem bypass (pallas_call fixed overhead would dominate).
    x3 = jax.random.normal(k3, (2, dim, 16), dtype=jnp.float32)
    out3, ld3 = inv_rotation_lu_forward(x3, *p_args)
    out3 = jax.block_until_ready(out3)
    ref3, rld3 = reference_forward(x3, params)
    assert jnp.allclose(out3, ref3, atol=1e-4, rtol=1e-4), "bypass path: output mismatch"
    assert jnp.allclose(ld3, rld3, atol=1e-4, rtol=1e-4), "bypass path: logdet mismatch"

    # 4) bf16 input: weight cast to bf16, f32 MXU accumulation, bf16 output.
    x4 = x1.astype(jnp.bfloat16)
    out4, _ = inv_rotation_lu_forward(x4, *p_args)
    out4 = jax.block_until_ready(out4)
    assert out4.dtype == jnp.bfloat16, "bf16 path: wrong output dtype"
    ref4, _ = reference_forward(x4.astype(jnp.float32), params)
    assert jnp.allclose(out4.astype(jnp.float32), ref4, atol=1e-1, rtol=5e-2), \
        "bf16 path: output mismatch"

    print("KERNEL_OK")
</pallas_src>

<mosaic_0001>
module attributes {stable_mosaic.version = 11 : i64} {
  func.func @_matmul_kernel(%arg0: i32, %arg1: i32, %arg2: memref<16x16xf32, #tpu.memory_space<vmem>>, %arg3: memref<1x16x128xf32, #tpu.memory_space<vmem>>, %arg4: memref<1x16x128xf32, #tpu.memory_space<vmem>>) attributes {dimension_semantics = [#tpu.dimension_semantics<parallel>, #tpu.dimension_semantics<parallel>], iteration_bounds = array<i64: 4, 3>, scalar_prefetch = 0 : i64, scratch_operands = 0 : i64, tpu.core_type = #tpu.core_type<tc>, window_params = [{pipeline_mode = #tpu.pipeline_mode<synchronous>, transform_indices = @transform_0, window_bounds = array<i64: 16, 16>}, {transform_indices = @transform_1, window_bounds = array<i64: 1, 16, 128>}, {transform_indices = @transform_2, window_bounds = array<i64: 1, 16, 128>}]} {
    %c0 = arith.constant 0 : index
    %c0_0 = arith.constant 0 : index
    %0 = vector.load %arg2[%c0, %c0_0] : memref<16x16xf32, #tpu.memory_space<vmem>>, vector<16x16xf32>
    %c0_1 = arith.constant 0 : index
    %c0_2 = arith.constant 0 : index
    %c0_3 = arith.constant 0 : index
    %1 = vector.load %arg3[%c0_1, %c0_2, %c0_3] : memref<1x16x128xf32, #tpu.memory_space<vmem>>, vector<1x16x128xf32>
    %2 = vector.shape_cast %1 : vector<1x16x128xf32> to vector<16x128xf32>
    %cst = arith.constant dense<0.000000e+00> : vector<16x128xf32>
    %3 = tpu.matmul %0, %2, %cst {dimension_numbers = #tpu.dot_dimension_numbers<[1], [0], [0], [1], [0, 0, 1, 1], [], []>} : vector<16x16xf32>, vector<16x128xf32>, vector<16x128xf32> -> vector<16x128xf32>
    %c0_4 = arith.constant 0 : index
    %c0_5 = arith.constant 0 : index
    %c0_6 = arith.constant 0 : index
    %4 = vector.load %arg4[%c0_4, %c0_5, %c0_6] : memref<1x16x128xf32, #tpu.memory_space<vmem>>, vector<1x16x128xf32>
    %5 = vector.shape_cast %4 : vector<1x16x128xf32> to vector<16x128xf32>
    %6 = vector.shape_cast %3 : vector<16x128xf32> to vector<1x16x128xf32>
    tpu.vector_store %arg4[%c0_4, %c0_5, %c0_6], %6 {strides = array<i32>} : memref<1x16x128xf32, #tpu.memory_space<vmem>>, vector<1x16x128xf32>,
    return
  }
  func.func @transform_0(%arg0: i32, %arg1: i32) -> (i32, i32) {
    %c0_i32 = arith.constant 0 : i32
    %c0_i32_0 = arith.constant 0 : i32
    %c0_i32_1 = arith.constant 0 : i32
    return %c0_i32, %c0_i32_0 : i32, i32
  }
  func.func @transform_1(%arg0: i32, %arg1: i32) -> (i32, i32, i32) {
    %c0_i32 = arith.constant 0 : i32
    %c0_i32_0 = arith.constant 0 : i32
    return %arg0, %c0_i32, %arg1 : i32, i32, i32
  }
  func.func @transform_2(%arg0: i32, %arg1: i32) -> (i32, i32, i32) {
    %c0_i32 = arith.constant 0 : i32
    %c0_i32_0 = arith.constant 0 : i32
    return %arg0, %c0_i32, %arg1 : i32, i32, i32
  }
}

</mosaic_0001>

<bundles_post_ra>
// kernel: tpu_custom_call.1
= control target key start
LH: loop header
LB: loop body
LE: loop exit
PB: predicated region body
PF: predicated region fallthrough
CT: control target
= control target key end

     0   :  { %s959_s0 = inlined_call_operand.hbm [shape: f32[16,16], index: 0, kind: input, shape index: {}]   ;;  %s960_s1 = inlined_call_operand.hbm [shape: f32[4,16,320], index: 1, kind: input, shape index: {}]   ;;  %s961_s2 = inlined_call_operand.hbm [shape: f32[4,16,320], index: 2, kind: output, shape index: {}]  }
   0x1   :  { %970 = sst [smem:[#allocation11_spill]] %s959_s0 }
   0x2   :  { %7 = vsyncpa [#allocation3], 0 }
   0x3   :  { %8 = vsyncpa [#allocation6], 0 }
   0x4   :  { %10 = vsyncpa [#allocation6 + $0x1], 0 }
   0x5   :  { %11 = vsyncpa [#allocation4], 0 }
   0x6   :  { %13 = vsyncpa [#allocation4 + $0x1], 0  ;;  %s712_s9 = smov 0   ;;  %s714_s10 = smov 0  }
   0x7   :  { %s716_s11 = smov 0   ;;  %s718_s12 = smov 0  }
   0x8   :  { %s720_s13 = smov 0   ;;  %s722_s14 = smov 0  }
   0x9   :  { %s724_s15 = smov 0   ;;  %s726_s16 = smov 0  }
   0xa LB: > { %s397_s17 = sadd.s32 4294967295, %s686_s16   ;;  %s398_s18 = sadd.s32 4294967294, %s686_s16   ;;  %s686_s16 = sphi %s726_s16, %s19_s16   ;;  %s682_s15 = sphi %s724_s15, %s995_s15   ;;  %s678_s14 = sphi %s722_s14, %s994_s14   ;;  %s674_s13 = sphi %s720_s13, %s993_s13   ;;  %s670_s12 = sphi %s718_s12, %s992_s12   ;;  %s666_s11 = sphi %s716_s11, %s991_s11   ;;  %s662_s10 = sphi %s714_s10, %s990_s10   ;;  %s658_s9 = sphi %s712_s9, %s989_s9  }
   0xb   : > { %p68_p0 = scmp.ne.s32.totalorder %s666_s11, %s662_s10  ;;  %p69_p1 = scmp.eq.s32.totalorder %s686_s16, 0 }
   0xc   : > { %p74_p2 = scmp.ne.s32.totalorder %s662_s10, %s658_s9  ;;  %p760_p3 = scmp.eq.s32.totalorder %s397_s17, 0 }
   0xd   : > { %p100_p4 = scmp.eq.s32.totalorder %s397_s17, 11  ;;  %p764_p5 = por %p69_p1, %p68_p0 }
   0xe   : > { %s971_s20 = scalar_select %p760_p3, 1, 0 }
   0xf   : > { %p106_p6 = scmp.eq.s32.totalorder %s398_s18, 11  ;;  %p770_p7 = por %p760_p3, %p74_p2 }
  0x10   : > { %p774_p8 = por %p100_p4, %p68_p0  ;;  %p399_p10 = scmp.ge.s32.totalorder %s686_s16, 1 }
  0x11   : > { %s973_s22 = scalar_select %p770_p7, 1, 0 }
  0x12   : > { %s974_s23 = scalar_select %p774_p8, 1, 0 }
  0x13   : > { %p778_p9 = por %p106_p6, %p74_p2  ;;  %p113_p11 = scmp.lt.s32.totalorder %s686_s16, 13 }
  0x14   : > { %s688_s26 = smov [#allocation2]   ;;  %p452_p0 = scmp.lt.s32.totalorder %s686_s16, 12 }
  0x15   : > { %s975_s24 = scalar_select %p778_p9, 1, 0 }
  0x16   : > { %p784_p12 = pnand %p399_p10, %p113_p11  ;;  %s125_s27 = sshll.u32 %s688_s26, 4  ;;  %s126_s27 = int_to_ptr.vmem [resolvable:$true] %s125_s27 }
  0x17   : > { %p799_p2 = pnand %p452_p0, %p764_p5  ;;  %s979_s0 = sld [smem:[#allocation11_spill]] }
  0x18   : > { %s976_s25 = scalar_select %p784_p12, 1, 0 }
  0x19   : > { %p439_p13 = pneg %p784_p12 }
  0x1a   : > { %s978_s29 = scalar_select %p799_p2, 1, 0 }
  0x1b   : > { %p793_p1 = pnand %p439_p13, %p760_p3 }
  0x1d   : > { %s526_s4 = scalar_lea.hbm %s979_s0, 256  ;;  %p528_p6 = pneg %p793_p1 }
  0x1e   : > { %p527_p4 = scmp.ne.s32.totalorder %s979_s0, %s526_s4  ;;  %p533_p13 = scmp.lt.u32.totalorder %s526_s4, %s979_s0 }
  0x20   : > { %p529_p10 = pnand %p528_p6, %p527_p4 }
  0x22   : > { %p530_p11 = pneg %p529_p10 }
  0x24   : > { %p535_p5 = pnand %p533_p13, %p530_p11 }
  0x26   : > { %538 = shalt.err (!%p535_p5)
}
  0x27   : > { %s539_s17 = scalar_lea.vmem %s126_s27, 256  ;;  %p547_p7 = scmp.lt.s32.totalorder %s126_s27, %s126_s27 }
  0x28   : > { %p540_p0 = scmp.ne.s32.totalorder %s126_s27, %s539_s17  ;;  %p548_p3 = scmp.lt.s32.totalorder %s539_s17, %s539_s17 }
  0x2a   : > { %p542_p9 = pnand %p540_p0, %p528_p6  ;;  %p549_p12 = por %p548_p3, %p547_p7 }
  0x2c   : > { %p543_p8 = pneg %p542_p9 }
  0x2e   : > { %p550_p2 = pnand %p549_p12, %p543_p8 }
  0x30   : > { %553 = shalt.err (!%p550_p2)
}
  0x31   : > { %s968_s18 = smov 128   ;;  %s969_s21 = smov 8  }
  0x32   : > { %442 = dma.hbm_to_vmem [thread:$0]  (!%p793_p1), %s979_s0, 256, %s126_s27, [#allocation3], %s968_s18, %s968_s18, %s969_s21  }
  0x33   : > { %s28_s3 = sadd.s32 1, %s678_s14  ;;  %s31_s4 = sadd.s32 1, %s682_s15 }
  0x34   : > { %p29_p3 = scmp.ge.s32.totalorder %s28_s3, 3  ;;  %s139_s5 = sand.u32 1, %s666_s11  }
  0x35   : > { %s429_s6 = smul.u32 6, %s682_s15  ;;  %s402_s28 = sshll.u32 %s139_s5, 4 }
  0x36   : > { %s997_s3 = smov (%p29_p3, %s28_s3), 0  ;;  %s999_s4 = smov (!%p29_p3, %s31_s4), %s682_s15 }
  0x37   : > { %s57_s7 = ssub.s32 %s678_s14, %s997_s3  ;;  %p33_p7 = scmp.ge.s32.totalorder %s999_s4, 4 }
  0x38   : > { %s148_s8 = sadd.s32 %s678_s14, %s429_s6  ;;  %s143_s17 = scalar_lea.vmem [#allocation5], %s402_s28 }
  0x39   : > { %s1001_s4 = smov (%p33_p7, %s999_s4), 0  ;;  %s403_s27 = sshll.u32 %s148_s8, 7 }
  0x3a   : > { %s151_s26 = sshll.u32 %s143_s17, 4  ;;  %s56_s30 = ssub.s32 %s682_s15, %s1001_s4  ;;  %s843_s26 = int_to_ptr.vmem [resolvable:$true] %s151_s26 }
  0x3b   : > { %s839_s21 = scalar_lea.hbm %s960_s1, %s403_s27  ;;  %s841_s0 = sor.u32 %s57_s7, %s56_s30 }
  0x3c   : > { %p59_p8 = scmp.eq.s32.totalorder %s841_s0, 0  ;;  %s846_s6 = scalar_lea.sflag [#allocation6], %s139_s5 }
  0x3d   : > { %s554_s28 = scalar_lea.hbm %s839_s21, 256  ;;  %p980_p12 = scmp.ne.s32.totalorder %s978_s29, 0 }
  0x3e   : > { %p555_p9 = scmp.ne.s32.totalorder %s839_s21, %s554_s28  ;;  %s559_s8 = scalar_lea.hbm %s960_s1, 3072 }
  0x3f   : > { %p556_p1 = pneg %p980_p12  ;;  %p560_p6 = scmp.lt.u32.totalorder %s839_s21, %s960_s1 }
  0x40   : > { %p561_p10 = scmp.lt.u32.totalorder %s559_s8, %s554_s28  ;;  %p563_p13 = scmp.lt.u32.totalorder %s554_s28, %s839_s21 }
  0x41   : > { %p557_p2 = pnand %p556_p1, %p555_p9 }
  0x42   : > { %p562_p11 = por %p561_p10, %p560_p6 }
  0x43   : > { %p558_p4 = pneg %p557_p2 }
  0x44   : > { %p564_p5 = por %p563_p13, %p562_p11 }
  0x46   : > { %p565_p0 = pnand %p564_p5, %p558_p4 }
  0x48   : > { %568 = shalt.err (!%p565_p0)
}
  0x49   : > { %s569_s5 = scalar_lea.vmem %s843_s26, 256  ;;  %s691_s17 = smov [#allocation5]  }
  0x4a   : > { %p570_p3 = scmp.ne.s32.totalorder %s843_s26, %s569_s5  ;;  %s574_s30 = sshll.u32 %s691_s17, 4  ;;  %s575_s30 = int_to_ptr.vmem [resolvable:$false] %s574_s30 }
  0x4b   : > { %s576_s19 = scalar_lea.vmem %s575_s30, 512  ;;  %p577_p2 = scmp.lt.s32.totalorder %s843_s26, %s575_s30 }
  0x4c   : > { %p572_p7 = pnand %p570_p3, %p556_p1  ;;  %p578_p6 = scmp.lt.s32.totalorder %s576_s19, %s569_s5 }
  0x4e   : > { %p573_p9 = pneg %p572_p7  ;;  %p579_p10 = por %p578_p6, %p577_p2 }
  0x50   : > { %p580_p11 = pnand %p579_p10, %p573_p9 }
  0x52   : > { %583 = shalt.err (!%p580_p11)
}
  0x53   : > { %s692_s28 = smov 384   ;;  %s981_s18 = smov 8  }
  0x54   : > { %s982_s8 = smov 128   ;;  %s983_s7 = sadd.s32 1, %s666_s11 }
  0x55   : > { %446 = dma.hbm_to_vmem [thread:$0]  (!%p980_p12), %s839_s21, 256, %s843_s26, %s846_s6, %s692_s28, %s982_s8, %s981_s18  }
  0x56   : > { %s881_s27 = scalar_select %p59_p8, %s666_s11, %s983_s7  }
  0x57   : > { %p984_p1 = scmp.ne.s32.totalorder %s976_s25, 0 }
  0x58   : > { %p985_p4 = scmp.ne.s32.totalorder (!%p984_p1), %s971_s20, 0 }
  0x59   : > { %163 = sbr.rel (%p984_p1) target bundleno = 337 (0x151), region = 28 }
  0x60   : > { %645 = dma.done.wait (%p985_p4), [#allocation3], 256  }
  0x61   : > { %647 = vsyncadd (%p985_p4), [#allocation3], 4294967040  ;;  %s890_s29 = sand.u32 1, %s662_s10   ;;  %p986_p8 = scmp.ne.s32.totalorder %s973_s22, 0 }
  0x62   : > { %s406_s21 = sshll.u32 %s890_s29, 4  ;;  %s170_s26 = scalar_lea.sflag [#allocation6], %s890_s29 }
  0x63   : > { %s173_s0 = scalar_lea.vmem [#allocation5], %s406_s21 }
  0x64   : > { %649 = dma.done.wait (%p986_p8), %s170_s26, 256  }
  0x65   : > { %651 = vsyncadd (%p986_p8), %s170_s26, 4294967040  ;;  %vm198_vm0 = vcmask 130048   ;;  %v196_v0 = vld [vmem:[%s173_s0] sm:$0xff]  ;;  %v197_v1 = vld [vmem:[%s173_s0 + $0x8] sm:$0xff]  ;;  %s430_s20 = smul.u32 6, %s674_s13  ;;  %s193_s6 = scalar_lea.vmem [#allocation7], %s406_s21 }
  0x66   : > { %v194_v2 = vld [vmem:[#allocation2] sm:$0xff]  ;;  %v425_v3 = vpack.c.bf16 %v197_v1, %v196_v0  ;;  %v195_v4 = vld [vmem:[#allocation2 + $0x8] sm:$0xff]  ;;  %s297_s5 = sshll.u32 %s193_s6, 4  ;;  %s283_s28 = scalar_lea.sflag [#allocation4], %s890_s29  ;;  %s900_s5 = int_to_ptr.vmem [resolvable:$true] %s297_s5 }
  0x67   : > { %422 = vmatprep.mubr.msk.f32.mxu0 %vm198_vm0, %v194_v2  ;;  %s294_s25 = sadd.s32 %s670_s12, %s430_s20  ;;  %s584_s13 = scalar_lea.vmem %s900_s5, 256 }
  0x68   : > { %426 = vmatprep.subr.bf16.mxu0 %v425_v3  ;;  %s411_s22 = sshll.u32 %s294_s25, 7  ;;  %p585_p12 = scmp.ne.s32.totalorder %s900_s5, %s584_s13 }
  0x69   : > { %428 = vmatpush3.bf16.msra.mxu0 %v425_v3  ;;  %s905_s19 = scalar_lea.hbm %s961_s2, %s411_s22  ;;  %p987_p13 = scmp.ne.s32.totalorder %s974_s23, 0 }
  0x6a   : > { %s693_s12 = smov [#allocation7]  }
  0x6b   : > { %p586_p5 = pnand %p585_p12, %p987_p13  ;;  %s588_s18 = sshll.u32 %s693_s12, 4  ;;  %s589_s18 = int_to_ptr.vmem [resolvable:$false] %s588_s18 }
  0x6c   : > { %423 = vmatmul.mubr.msk.f32.vlgmr.msra.gmra.mrb[0].mxu0 %vm198_vm0, %v195_v4  ;;  %s590_s8 = scalar_lea.vmem %s589_s18, 512  ;;  %p591_p3 = scmp.lt.s32.totalorder %s900_s5, %s589_s18 }
  0x6d   : > { %p587_p0 = pneg %p586_p5  ;;  %p592_p7 = scmp.lt.s32.totalorder %s590_s8, %s584_s13 }
  0x6f   : > { %p593_p9 = por %p592_p7, %p591_p3 }
  0x71   : > { %p594_p2 = pnand %p593_p9, %p587_p0 }
 0x13f   : > { %v424_v5 = vpop.f32.mrb[0].mxu0 }
 0x140   : > { %281 = vst [vmem:[%s193_s6 + $0x8] sm:$0xff] %v424_v5  ;;  %v271_v6 = vpop.f32.mrb[1].mxu0 }
 0x141   : > { %280 = vst [vmem:[%s193_s6] sm:$0xff] %v271_v6 }
 0x142   : > { %597 = shalt.err (!%p594_p2)
}
 0x143   : > { %s598_s7 = scalar_lea.hbm %s905_s19, 256  ;;  %s602_s0 = scalar_lea.hbm %s961_s2, 3072 }
 0x144   : > { %p599_p6 = scmp.ne.s32.totalorder %s905_s19, %s598_s7  ;;  %p603_p1 = scmp.lt.u32.totalorder %s905_s19, %s961_s2 }
 0x145   : > { %p604_p4 = scmp.lt.u32.totalorder %s602_s0, %s598_s7  ;;  %p606_p12 = scmp.lt.u32.totalorder %s598_s7, %s905_s19 }
 0x146   : > { %p600_p10 = pnand %p599_p6, %p987_p13 }
 0x147   : > { %p605_p8 = por %p604_p4, %p603_p1 }
 0x148   : > { %p601_p11 = pneg %p600_p10 }
 0x149   : > { %p607_p5 = por %p606_p12, %p605_p8 }
 0x14b   : > { %p608_p0 = pnand %p607_p5, %p601_p11 }
 0x14d   : > { %611 = shalt.err (!%p608_p0)
}
 0x14e   : > { %s694_s6 = smov 128   ;;  %s695_s22 = smov 384  }
 0x14f   : > { %s696_s17 = smov 8  }
 0x150   : > { %437 = dma.vmem_to_hbm [thread:$0]  (%p987_p13), %s900_s5, 256, %s905_s19, %s283_s28, %s694_s6, %s695_s22, %s696_s17  }
 0x151 PF: > { %p454_p3 = scmp.ge.s32.totalorder %s686_s16, 2  ;;  %s312_s30 = sand.u32 1, %s658_s9  }
 0x152   : > { %p988_p7 = scmp.ne.s32.totalorder %s975_s24, 0  ;;  %s313_s13 = scalar_lea.sflag [#allocation4], %s312_s30 }
 0x154   : > { %p448_p9 = pnand %p454_p3, %p988_p7 }
 0x156   : > { %653 = dma.done.wait (!%p448_p9), %s313_s13, 256  }
 0x157   : > { %655 = vsyncadd (!%p448_p9), %s313_s13, 4294967040  ;;  %s19_s16 = sadd.s32 1, %s686_s16   ;;  %s989_s9 = smov %s662_s10 }
 0x158   : > { %p16_p2 = scmp.ge.s32.totalorder %s19_s16, 14   ;;  %s990_s10 = smov %s666_s11 }
 0x159   : > { %s991_s11 = smov %s881_s27  ;;  %s992_s12 = smov %s678_s14 }
 0x15a   : > { %s993_s13 = smov %s682_s15  ;;  %s994_s14 = smov %s997_s3 }
 0x15b   : > { %s995_s15 = smov %s1001_s4  ;;  %18 = sbr.rel (!%p16_p2) target bundleno = 10 (0xa), region = 78 }
 0x162   :  { %318 = vsyncpa [#allocation3], 1 }
 0x163   :  { %320 = vsyncpa [#allocation3 + $0x1], 1 }
 0x164   :  { %321 = vsyncpa [#allocation6], 1 }
 0x165   :  { %323 = vsyncpa [#allocation6 + $0x1], 1 }
 0x166   :  { %324 = vsyncpa [#allocation4], 1 }
 0x167   :  { %326 = vsyncpa [#allocation4 + $0x1], 1 }

</bundles_post_ra>
